<compile_context>
chip_gen: v6e
topology: v6e:2x2x1
jax: 0.10.0
libtpu: 0.0.40
codegen_flags: <defaults>
</compile_context>

<pallas_src>
import math
from functools import lru_cache

import numpy as np
import jax
import jax.numpy as jnp
from jax.experimental import pallas as pl
from jax.experimental.pallas import tpu as pltpu

_BN_EPS = 1e-5


# ----------------------------- Pallas kernel --------------------------------

def _make_enblock_kernel(C, H, W, N):
    """C channels, HxW spatial, N = B*H*W flattened lane axis."""
    # Flat lane shift of each of the 9 conv taps (ky, kx) in {-1,0,1}^2.
    shifts = [(k // 3 - 1) * W + (k % 3 - 1) for k in range(9)]

    def kernel(x_ref, bn_ref, mask_ref, w1_ref, w2_ref, o_ref, col_ref):
        x = x_ref[...]                                  # (C, N) f32
        masks = mask_ref[...]                           # (9, N) f32 (hoisted)

        def stage(a, g, b, w_ref):
            # Training-mode BatchNorm over the batch (biased variance, as
            # nn.BatchNorm2d) -> per-channel affine -> ReLU.  With channels on
            # sublanes and B*H*W on lanes this is one lane reduction per stat.
            mean = jnp.mean(a, axis=1, keepdims=True)                 # (C, 1)
            d = a - mean
            var = jnp.mean(d * d, axis=1, keepdims=True)              # (C, 1)
            scale = g * jax.lax.rsqrt(var + _BN_EPS)
            bias = b - mean * scale
            act = jnp.maximum(a * scale + bias, 0.0)                  # (C, N)

            # 3x3 conv (pad=1): im2col via 9 flat lane rotations + boundary
            # masks, each tap stored directly into the (9C, N) VMEM scratch
            # (static slices, sublane-aligned for C % 8 == 0).  Wrapped reads
            # (row/col/image boundaries) are zeroed by the masks.
            for k, s in enumerate(shifts):
                shifted = act if s == 0 else pltpu.roll(act, (-s) % N, axis=1)
                col_ref[k * C:(k + 1) * C, :] = shifted * masks[k:k + 1, :]

            # Single MXU matmul per stage: (C, 9C) @ (9C, N), bf16 inputs,
            # f32 accumulation.  Cast the whole col buffer once.
            col = col_ref[...].astype(jnp.bfloat16)
            return jnp.dot(w_ref[...], col,
                           preferred_element_type=jnp.float32)        # (C, N)

        x1 = stage(x, bn_ref[:, 0:1], bn_ref[:, 1:2], w1_ref)   # conv1(relu(bn1(x)))
        y = stage(x1, bn_ref[:, 2:3], bn_ref[:, 3:4], w2_ref) + x
        o_ref[...] = y.astype(o_ref.dtype)

    return kernel


# ------------------------------ JAX glue -------------------------------------

def quantize_weight(w, k_bits=32):
    """quant_weight.forward: symmetric max-scaled round-trip (f32, as torch).
    At k_bits=32 this is numerically (near-)identity; done once at prep time."""
    qmax = 2.0 ** (k_bits - 1) - 1.0
    max_val = jnp.max(jnp.abs(w)) + 1e-8
    return jnp.round(w * qmax / max_val) * max_val / qmax


def _to_wmat(w_oihw):
    """(Cout, Cin, 3, 3) torch layout -> (Cout, 9*Cin), tap-major / channel-minor
    to match the col buffer layout [tap0 rows(C), tap1 rows(C), ...]."""
    cout, cin = w_oihw.shape[0], w_oihw.shape[1]
    return jnp.transpose(w_oihw, (0, 2, 3, 1)).reshape(cout, 9 * cin)


def prepare_params(params):
    """One-time parameter prep (hoisted off the per-forward critical path):
    quantize + im2col-layout + bf16-cast weights, pack BN affines into (C, 4)."""
    w1 = _to_wmat(quantize_weight(params["w1"])).astype(jnp.bfloat16)
    w2 = _to_wmat(quantize_weight(params["w2"])).astype(jnp.bfloat16)
    bn_pack = jnp.stack(
        [params["gamma1"], params["beta1"], params["gamma2"], params["beta2"]],
        axis=1).astype(jnp.float32)                       # (C, 4)
    return dict(w1_mat=w1, w2_mat=w2, bn_pack=bn_pack)


@lru_cache(maxsize=None)
def _tap_masks(B, H, W):
    """(9, B*H*W) validity masks for the 9 conv taps on the flat lane axis."""
    HW = H * W
    hh, ww = np.divmod(np.arange(HW), W)
    m = np.zeros((9, HW), np.float32)
    for k in range(9):
        ky, kx = k // 3 - 1, k % 3 - 1
        m[k] = ((hh + ky >= 0) & (hh + ky < H) &
                (ww + kx >= 0) & (ww + kx < W)).astype(np.float32)
    return np.tile(m, (1, B))                             # depends only on q%HW


def en_block_forward(x_nchw, prep):
    """EnBlock.forward with bits=None (default path). NCHW in / NCHW out."""
    B, C, H, W = x_nchw.shape
    HW = H * W
    N = B * HW

    # Channels on sublanes, flat (B*H*W) on lanes -> lane-dense in/out slabs.
    x_cn = jnp.transpose(x_nchw.reshape(B, C, HW), (1, 0, 2)).reshape(C, N)
    masks = jnp.asarray(_tap_masks(B, H, W))

    y_cn = pl.pallas_call(
        _make_enblock_kernel(C, H, W, N),
        out_shape=jax.ShapeDtypeStruct((C, N), x_nchw.dtype),
        grid_spec=pltpu.PrefetchScalarGridSpec(
            num_scalar_prefetch=0,
            grid=(1,),
            in_specs=[
                pl.BlockSpec((C, N), lambda i: (0, 0)),        # x
                pl.BlockSpec((C, 4), lambda i: (0, 0)),        # packed BN affines
                pl.BlockSpec((9, N), lambda i: (0, 0)),        # tap masks
                pl.BlockSpec((C, 9 * C), lambda i: (0, 0)),    # w1 (bf16)
                pl.BlockSpec((C, 9 * C), lambda i: (0, 0)),    # w2 (bf16)
            ],
            out_specs=pl.BlockSpec((C, N), lambda i: (0, 0)),
            scratch_shapes=[pltpu.VMEM((9 * C, N), jnp.float32)],  # im2col buf
        ),
        compiler_params=pltpu.CompilerParams(
            dimension_semantics=("arbitrary",),
            vmem_limit_bytes=32 * 1024 * 1024),
    )(x_cn, prep["bn_pack"], masks, prep["w1_mat"], prep["w2_mat"])

    return jnp.transpose(y_cn.reshape(C, B, HW), (1, 0, 2)).reshape(B, C, H, W)


# ------------------------------ reference ------------------------------------

def ref_forward(x_nchw, params):
    def bn(x, g, b):
        mean = jnp.mean(x, axis=(0, 2, 3), keepdims=True)
        var = jnp.mean((x - mean) ** 2, axis=(0, 2, 3), keepdims=True)
        xn = (x - mean) / jnp.sqrt(var + _BN_EPS)
        return xn * g.reshape(1, -1, 1, 1) + b.reshape(1, -1, 1, 1)

    def conv(x, w):
        return jax.lax.conv_general_dilated(
            x, w, (1, 1), ((1, 1), (1, 1)),
            dimension_numbers=("NCHW", "OIHW", "NCHW"),
            precision=jax.lax.Precision.HIGHEST)

    x1 = conv(jax.nn.relu(bn(x_nchw, params["gamma1"], params["beta1"])),
              quantize_weight(params["w1"]))
    y = conv(jax.nn.relu(bn(x1, params["gamma2"], params["beta2"])),
             quantize_weight(params["w2"]))
    return y + x_nchw


# -------------------------------- main ----------------------------------------

if __name__ == "__main__":
    B, C, H, W = 2, 8, 16, 16
    key = jax.random.PRNGKey(0)
    kx, kw1, kw2, kg1, kb1, kg2, kb2 = jax.random.split(key, 7)

    x = jax.random.normal(kx, (B, C, H, W), jnp.float32)

    # QuantConv2d.reset_parameters: uniform(-stdv, stdv), stdv = 1/sqrt(Cin*3*3)
    stdv = 1.0 / math.sqrt(C * 3 * 3)
    params = dict(
        w1=jax.random.uniform(kw1, (C, C, 3, 3), jnp.float32, -stdv, stdv),
        w2=jax.random.uniform(kw2, (C, C, 3, 3), jnp.float32, -stdv, stdv),
        gamma1=1.0 + 0.1 * jax.random.normal(kg1, (C,), jnp.float32),
        beta1=0.1 * jax.random.normal(kb1, (C,), jnp.float32),
        gamma2=1.0 + 0.1 * jax.random.normal(kg2, (C,), jnp.float32),
        beta2=0.1 * jax.random.normal(kb2, (C,), jnp.float32),
    )

    prep = prepare_params(params)          # one-time weight/BN prep (hoisted)

    y = en_block_forward(x, prep)
    y = jax.block_until_ready(y)
    assert y.shape == (B, C, H, W) and y.dtype == jnp.float32

    # Tolerance loosened vs an all-f32 kernel because the MXU inputs are bf16
    # (f32 accumulation); the f32 reference is the PyTorch-semantics baseline.
    y_ref = jax.block_until_ready(ref_forward(x, params))
    np.testing.assert_allclose(np.asarray(y), np.asarray(y_ref),
                               atol=4e-2, rtol=4e-2)
    print("KERNEL_OK")
</pallas_src>

<mosaic_0001>
module attributes {stable_mosaic.version = 11 : i64} {
  func.func @kernel(%arg0: i32, %arg1: memref<8x512xf32, #tpu.memory_space<vmem>>, %arg2: memref<8x4xf32, #tpu.memory_space<vmem>>, %arg3: memref<9x512xf32, #tpu.memory_space<vmem>>, %arg4: memref<8x72xbf16, #tpu.memory_space<vmem>>, %arg5: memref<8x72xbf16, #tpu.memory_space<vmem>>, %arg6: memref<8x512xf32, #tpu.memory_space<vmem>>, %arg7: memref<72x512xf32, #tpu.memory_space<vmem>>) attributes {dimension_semantics = [#tpu.dimension_semantics<arbitrary>], iteration_bounds = array<i64: 1>, scalar_prefetch = 0 : i64, scratch_operands = 1 : i64, tpu.core_type = #tpu.core_type<tc>, window_params = [{pipeline_mode = #tpu.pipeline_mode<synchronous>, transform_indices = @transform_0, window_bounds = array<i64: 8, 512>}, {pipeline_mode = #tpu.pipeline_mode<synchronous>, transform_indices = @transform_1, window_bounds = array<i64: 8, 4>}, {pipeline_mode = #tpu.pipeline_mode<synchronous>, transform_indices = @transform_2, window_bounds = array<i64: 9, 512>}, {pipeline_mode = #tpu.pipeline_mode<synchronous>, transform_indices = @transform_3, window_bounds = array<i64: 8, 72>}, {pipeline_mode = #tpu.pipeline_mode<synchronous>, transform_indices = @transform_4, window_bounds = array<i64: 8, 72>}, {pipeline_mode = #tpu.pipeline_mode<synchronous>, transform_indices = @transform_5, window_bounds = array<i64: 8, 512>}]} {
    %c0 = arith.constant 0 : index
    %c0_0 = arith.constant 0 : index
    %0 = vector.load %arg1[%c0, %c0_0] : memref<8x512xf32, #tpu.memory_space<vmem>>, vector<8x512xf32>
    %c0_1 = arith.constant 0 : index
    %c0_2 = arith.constant 0 : index
    %1 = vector.load %arg3[%c0_1, %c0_2] : memref<9x512xf32, #tpu.memory_space<vmem>>, vector<9x512xf32>
    %c0_3 = arith.constant 0 : index
    %c0_4 = arith.constant 0 : index
    %2 = vector.load %arg2[%c0_3, %c0_4] : memref<8x4xf32, #tpu.memory_space<vmem>>, vector<8x1xf32>
    %c0_5 = arith.constant 0 : index
    %c1 = arith.constant 1 : index
    %3 = vector.load %arg2[%c0_5, %c1] : memref<8x4xf32, #tpu.memory_space<vmem>>, vector<8x1xf32>
    %cst = arith.constant dense<0.000000e+00> : vector<8xf32>
    %4 = vector.multi_reduction <add>, %0, %cst [1] : vector<8x512xf32> to vector<8xf32>
    %5 = vector.shape_cast %4 : vector<8xf32> to vector<8x1xf32>
    %cst_6 = arith.constant 5.120000e+02 : f32
    %6 = vector.broadcast %cst_6 : f32 to vector<8x1xf32>
    %7 = arith.divf %5, %6 : vector<8x1xf32>
    %8 = vector.broadcast %7 : vector<8x1xf32> to vector<8x512xf32>
    %9 = arith.subf %0, %8 : vector<8x512xf32>
    %10 = arith.mulf %9, %9 : vector<8x512xf32>
    %cst_7 = arith.constant dense<0.000000e+00> : vector<8xf32>
    %11 = vector.multi_reduction <add>, %10, %cst_7 [1] : vector<8x512xf32> to vector<8xf32>
    %12 = vector.shape_cast %11 : vector<8xf32> to vector<8x1xf32>
    %cst_8 = arith.constant 5.120000e+02 : f32
    %13 = vector.broadcast %cst_8 : f32 to vector<8x1xf32>
    %14 = arith.divf %12, %13 : vector<8x1xf32>
    %cst_9 = arith.constant 9.99999974E-6 : f32
    %15 = vector.broadcast %cst_9 : f32 to vector<8x1xf32>
    %16 = arith.addf %14, %15 : vector<8x1xf32>
    %17 = math.rsqrt %16 : vector<8x1xf32>
    %18 = arith.mulf %2, %17 : vector<8x1xf32>
    %19 = arith.mulf %7, %18 : vector<8x1xf32>
    %20 = arith.subf %3, %19 : vector<8x1xf32>
    %21 = vector.broadcast %18 : vector<8x1xf32> to vector<8x512xf32>
    %22 = arith.mulf %0, %21 : vector<8x512xf32>
    %23 = vector.broadcast %20 : vector<8x1xf32> to vector<8x512xf32>
    %24 = arith.addf %22, %23 : vector<8x512xf32>
    %cst_10 = arith.constant 0.000000e+00 : f32
    %25 = vector.broadcast %cst_10 : f32 to vector<8x512xf32>
    %26 = arith.maximumf %24, %25 : vector<8x512xf32>
    %c17_i32 = arith.constant 17 : i32
    %27 = tpu.dynamic_rotate %26 by %c17_i32 dim 1 : vector<8x512xf32>, i32 -> vector<8x512xf32>
    %28 = vector.extract_strided_slice %1 {offsets = [0, 0], sizes = [1, 512], strides = [1, 1]} : vector<9x512xf32> to vector<1x512xf32>
    %29 = vector.broadcast %28 : vector<1x512xf32> to vector<8x512xf32>
    %30 = arith.mulf %27, %29 : vector<8x512xf32>
    %c0_11 = arith.constant 0 : index
    %c0_12 = arith.constant 0 : index
    %31 = vector.load %arg7[%c0_11, %c0_12] : memref<72x512xf32, #tpu.memory_space<vmem>>, vector<8x512xf32>
    tpu.vector_store %arg7[%c0_11, %c0_12], %30 {strides = array<i32>} : memref<72x512xf32, #tpu.memory_space<vmem>>, vector<8x512xf32>,
    %c16_i32 = arith.constant 16 : i32
    %32 = tpu.dynamic_rotate %26 by %c16_i32 dim 1 : vector<8x512xf32>, i32 -> vector<8x512xf32>
    %33 = vector.extract_strided_slice %1 {offsets = [1, 0], sizes = [1, 512], strides = [1, 1]} : vector<9x512xf32> to vector<1x512xf32>
    %34 = vector.broadcast %33 : vector<1x512xf32> to vector<8x512xf32>
    %35 = arith.mulf %32, %34 : vector<8x512xf32>
    %c8 = arith.constant 8 : index
    %c0_13 = arith.constant 0 : index
    %36 = vector.load %arg7[%c8, %c0_13] : memref<72x512xf32, #tpu.memory_space<vmem>>, vector<8x512xf32>
    tpu.vector_store %arg7[%c8, %c0_13], %35 {strides = array<i32>} : memref<72x512xf32, #tpu.memory_space<vmem>>, vector<8x512xf32>,
    %c15_i32 = arith.constant 15 : i32
    %37 = tpu.dynamic_rotate %26 by %c15_i32 dim 1 : vector<8x512xf32>, i32 -> vector<8x512xf32>
    %38 = vector.extract_strided_slice %1 {offsets = [2, 0], sizes = [1, 512], strides = [1, 1]} : vector<9x512xf32> to vector<1x512xf32>
    %39 = vector.broadcast %38 : vector<1x512xf32> to vector<8x512xf32>
    %40 = arith.mulf %37, %39 : vector<8x512xf32>
    %c16 = arith.constant 16 : index
    %c0_14 = arith.constant 0 : index
    %41 = vector.load %arg7[%c16, %c0_14] : memref<72x512xf32, #tpu.memory_space<vmem>>, vector<8x512xf32>
    tpu.vector_store %arg7[%c16, %c0_14], %40 {strides = array<i32>} : memref<72x512xf32, #tpu.memory_space<vmem>>, vector<8x512xf32>,
    %c1_i32 = arith.constant 1 : i32
    %42 = tpu.dynamic_rotate %26 by %c1_i32 dim 1 : vector<8x512xf32>, i32 -> vector<8x512xf32>
    %43 = vector.extract_strided_slice %1 {offsets = [3, 0], sizes = [1, 512], strides = [1, 1]} : vector<9x512xf32> to vector<1x512xf32>
    %44 = vector.broadcast %43 : vector<1x512xf32> to vector<8x512xf32>
    %45 = arith.mulf %42, %44 : vector<8x512xf32>
    %c24 = arith.constant 24 : index
    %c0_15 = arith.constant 0 : index
    %46 = vector.load %arg7[%c24, %c0_15] : memref<72x512xf32, #tpu.memory_space<vmem>>, vector<8x512xf32>
    tpu.vector_store %arg7[%c24, %c0_15], %45 {strides = array<i32>} : memref<72x512xf32, #tpu.memory_space<vmem>>, vector<8x512xf32>,
    %47 = vector.extract_strided_slice %1 {offsets = [4, 0], sizes = [1, 512], strides = [1, 1]} : vector<9x512xf32> to vector<1x512xf32>
    %48 = vector.broadcast %47 : vector<1x512xf32> to vector<8x512xf32>
    %49 = arith.mulf %26, %48 : vector<8x512xf32>
    %c32 = arith.constant 32 : index
    %c0_16 = arith.constant 0 : index
    %50 = vector.load %arg7[%c32, %c0_16] : memref<72x512xf32, #tpu.memory_space<vmem>>, vector<8x512xf32>
    tpu.vector_store %arg7[%c32, %c0_16], %49 {strides = array<i32>} : memref<72x512xf32, #tpu.memory_space<vmem>>, vector<8x512xf32>,
    %c511_i32 = arith.constant 511 : i32
    %51 = tpu.dynamic_rotate %26 by %c511_i32 dim 1 : vector<8x512xf32>, i32 -> vector<8x512xf32>
    %52 = vector.extract_strided_slice %1 {offsets = [5, 0], sizes = [1, 512], strides = [1, 1]} : vector<9x512xf32> to vector<1x512xf32>
    %53 = vector.broadcast %52 : vector<1x512xf32> to vector<8x512xf32>
    %54 = arith.mulf %51, %53 : vector<8x512xf32>
    %c40 = arith.constant 40 : index
    %c0_17 = arith.constant 0 : index
    %55 = vector.load %arg7[%c40, %c0_17] : memref<72x512xf32, #tpu.memory_space<vmem>>, vector<8x512xf32>
    tpu.vector_store %arg7[%c40, %c0_17], %54 {strides = array<i32>} : memref<72x512xf32, #tpu.memory_space<vmem>>, vector<8x512xf32>,
    %c497_i32 = arith.constant 497 : i32
    %56 = tpu.dynamic_rotate %26 by %c497_i32 dim 1 : vector<8x512xf32>, i32 -> vector<8x512xf32>
    %57 = vector.extract_strided_slice %1 {offsets = [6, 0], sizes = [1, 512], strides = [1, 1]} : vector<9x512xf32> to vector<1x512xf32>
    %58 = vector.broadcast %57 : vector<1x512xf32> to vector<8x512xf32>
    %59 = arith.mulf %56, %58 : vector<8x512xf32>
    %c48 = arith.constant 48 : index
    %c0_18 = arith.constant 0 : index
    %60 = vector.load %arg7[%c48, %c0_18] : memref<72x512xf32, #tpu.memory_space<vmem>>, vector<8x512xf32>
    tpu.vector_store %arg7[%c48, %c0_18], %59 {strides = array<i32>} : memref<72x512xf32, #tpu.memory_space<vmem>>, vector<8x512xf32>,
    %c496_i32 = arith.constant 496 : i32
    %61 = tpu.dynamic_rotate %26 by %c496_i32 dim 1 : vector<8x512xf32>, i32 -> vector<8x512xf32>
    %62 = vector.extract_strided_slice %1 {offsets = [7, 0], sizes = [1, 512], strides = [1, 1]} : vector<9x512xf32> to vector<1x512xf32>
    %63 = vector.broadcast %62 : vector<1x512xf32> to vector<8x512xf32>
    %64 = arith.mulf %61, %63 : vector<8x512xf32>
    %c56 = arith.constant 56 : index
    %c0_19 = arith.constant 0 : index
    %65 = vector.load %arg7[%c56, %c0_19] : memref<72x512xf32, #tpu.memory_space<vmem>>, vector<8x512xf32>
    tpu.vector_store %arg7[%c56, %c0_19], %64 {strides = array<i32>} : memref<72x512xf32, #tpu.memory_space<vmem>>, vector<8x512xf32>,
    %c495_i32 = arith.constant 495 : i32
    %66 = tpu.dynamic_rotate %26 by %c495_i32 dim 1 : vector<8x512xf32>, i32 -> vector<8x512xf32>
    %67 = vector.extract_strided_slice %1 {offsets = [8, 0], sizes = [1, 512], strides = [1, 1]} : vector<9x512xf32> to vector<1x512xf32>
    %68 = vector.broadcast %67 : vector<1x512xf32> to vector<8x512xf32>
    %69 = arith.mulf %66, %68 : vector<8x512xf32>
    %c64 = arith.constant 64 : index
    %c0_20 = arith.constant 0 : index
    %70 = vector.load %arg7[%c64, %c0_20] : memref<72x512xf32, #tpu.memory_space<vmem>>, vector<8x512xf32>
    tpu.vector_store %arg7[%c64, %c0_20], %69 {strides = array<i32>} : memref<72x512xf32, #tpu.memory_space<vmem>>, vector<8x512xf32>,
    %c0_21 = arith.constant 0 : index
    %c0_22 = arith.constant 0 : index
    %71 = vector.load %arg7[%c0_21, %c0_22] : memref<72x512xf32, #tpu.memory_space<vmem>>, vector<72x512xf32>
    %72 = arith.truncf %71 : vector<72x512xf32> to vector<72x512xbf16>
    %c0_23 = arith.constant 0 : index
    %c0_24 = arith.constant 0 : index
    %73 = vector.load %arg4[%c0_23, %c0_24] : memref<8x72xbf16, #tpu.memory_space<vmem>>, vector<8x72xbf16>
    %cst_25 = arith.constant dense<0.000000e+00> : vector<8x512xf32>
    %74 = tpu.matmul %73, %72, %cst_25 {dimension_numbers = #tpu.dot_dimension_numbers<[1], [0], [0], [1], [0, 0, 1, 1], [], []>} : vector<8x72xbf16>, vector<72x512xbf16>, vector<8x512xf32> -> vector<8x512xf32>
    %c0_26 = arith.constant 0 : index
    %c2 = arith.constant 2 : index
    %75 = vector.load %arg2[%c0_26, %c2] : memref<8x4xf32, #tpu.memory_space<vmem>>, vector<8x1xf32>
    %c0_27 = arith.constant 0 : index
    %c3 = arith.constant 3 : index
    %76 = vector.load %arg2[%c0_27, %c3] : memref<8x4xf32, #tpu.memory_space<vmem>>, vector<8x1xf32>
    %cst_28 = arith.constant dense<0.000000e+00> : vector<8xf32>
    %77 = vector.multi_reduction <add>, %74, %cst_28 [1] : vector<8x512xf32> to vector<8xf32>
    %78 = vector.shape_cast %77 : vector<8xf32> to vector<8x1xf32>
    %cst_29 = arith.constant 5.120000e+02 : f32
    %79 = vector.broadcast %cst_29 : f32 to vector<8x1xf32>
    %80 = arith.divf %78, %79 : vector<8x1xf32>
    %81 = vector.broadcast %80 : vector<8x1xf32> to vector<8x512xf32>
    %82 = arith.subf %74, %81 : vector<8x512xf32>
    %83 = arith.mulf %82, %82 : vector<8x512xf32>
    %cst_30 = arith.constant dense<0.000000e+00> : vector<8xf32>
    %84 = vector.multi_reduction <add>, %83, %cst_30 [1] : vector<8x512xf32> to vector<8xf32>
    %85 = vector.shape_cast %84 : vector<8xf32> to vector<8x1xf32>
    %cst_31 = arith.constant 5.120000e+02 : f32
    %86 = vector.broadcast %cst_31 : f32 to vector<8x1xf32>
    %87 = arith.divf %85, %86 : vector<8x1xf32>
    %cst_32 = arith.constant 9.99999974E-6 : f32
    %88 = vector.broadcast %cst_32 : f32 to vector<8x1xf32>
    %89 = arith.addf %87, %88 : vector<8x1xf32>
    %90 = math.rsqrt %89 : vector<8x1xf32>
    %91 = arith.mulf %75, %90 : vector<8x1xf32>
    %92 = arith.mulf %80, %91 : vector<8x1xf32>
    %93 = arith.subf %76, %92 : vector<8x1xf32>
    %94 = vector.broadcast %91 : vector<8x1xf32> to vector<8x512xf32>
    %95 = arith.mulf %74, %94 : vector<8x512xf32>
    %96 = vector.broadcast %93 : vector<8x1xf32> to vector<8x512xf32>
    %97 = arith.addf %95, %96 : vector<8x512xf32>
    %cst_33 = arith.constant 0.000000e+00 : f32
    %98 = vector.broadcast %cst_33 : f32 to vector<8x512xf32>
    %99 = arith.maximumf %97, %98 : vector<8x512xf32>
    %c17_i32_34 = arith.constant 17 : i32
    %100 = tpu.dynamic_rotate %99 by %c17_i32_34 dim 1 : vector<8x512xf32>, i32 -> vector<8x512xf32>
    %101 = vector.extract_strided_slice %1 {offsets = [0, 0], sizes = [1, 512], strides = [1, 1]} : vector<9x512xf32> to vector<1x512xf32>
    %102 = vector.broadcast %101 : vector<1x512xf32> to vector<8x512xf32>
    %103 = arith.mulf %100, %102 : vector<8x512xf32>
    %c0_35 = arith.constant 0 : index
    %c0_36 = arith.constant 0 : index
    %104 = vector.load %arg7[%c0_35, %c0_36] : memref<72x512xf32, #tpu.memory_space<vmem>>, vector<8x512xf32>
    tpu.vector_store %arg7[%c0_35, %c0_36], %103 {strides = array<i32>} : memref<72x512xf32, #tpu.memory_space<vmem>>, vector<8x512xf32>,
    %c16_i32_37 = arith.constant 16 : i32
    %105 = tpu.dynamic_rotate %99 by %c16_i32_37 dim 1 : vector<8x512xf32>, i32 -> vector<8x512xf32>
    %106 = vector.extract_strided_slice %1 {offsets = [1, 0], sizes = [1, 512], strides = [1, 1]} : vector<9x512xf32> to vector<1x512xf32>
    %107 = vector.broadcast %106 : vector<1x512xf32> to vector<8x512xf32>
    %108 = arith.mulf %105, %107 : vector<8x512xf32>
    %c8_38 = arith.constant 8 : index
    %c0_39 = arith.constant 0 : index
    %109 = vector.load %arg7[%c8_38, %c0_39] : memref<72x512xf32, #tpu.memory_space<vmem>>, vector<8x512xf32>
    tpu.vector_store %arg7[%c8_38, %c0_39], %108 {strides = array<i32>} : memref<72x512xf32, #tpu.memory_space<vmem>>, vector<8x512xf32>,
    %c15_i32_40 = arith.constant 15 : i32
    %110 = tpu.dynamic_rotate %99 by %c15_i32_40 dim 1 : vector<8x512xf32>, i32 -> vector<8x512xf32>
    %111 = vector.extract_strided_slice %1 {offsets = [2, 0], sizes = [1, 512], strides = [1, 1]} : vector<9x512xf32> to vector<1x512xf32>
    %112 = vector.broadcast %111 : vector<1x512xf32> to vector<8x512xf32>
    %113 = arith.mulf %110, %112 : vector<8x512xf32>
    %c16_41 = arith.constant 16 : index
    %c0_42 = arith.constant 0 : index
    %114 = vector.load %arg7[%c16_41, %c0_42] : memref<72x512xf32, #tpu.memory_space<vmem>>, vector<8x512xf32>
    tpu.vector_store %arg7[%c16_41, %c0_42], %113 {strides = array<i32>} : memref<72x512xf32, #tpu.memory_space<vmem>>, vector<8x512xf32>,
    %c1_i32_43 = arith.constant 1 : i32
    %115 = tpu.dynamic_rotate %99 by %c1_i32_43 dim 1 : vector<8x512xf32>, i32 -> vector<8x512xf32>
    %116 = vector.extract_strided_slice %1 {offsets = [3, 0], sizes = [1, 512], strides = [1, 1]} : vector<9x512xf32> to vector<1x512xf32>
    %117 = vector.broadcast %116 : vector<1x512xf32> to vector<8x512xf32>
    %118 = arith.mulf %115, %117 : vector<8x512xf32>
    %c24_44 = arith.constant 24 : index
    %c0_45 = arith.constant 0 : index
    %119 = vector.load %arg7[%c24_44, %c0_45] : memref<72x512xf32, #tpu.memory_space<vmem>>, vector<8x512xf32>
    tpu.vector_store %arg7[%c24_44, %c0_45], %118 {strides = array<i32>} : memref<72x512xf32, #tpu.memory_space<vmem>>, vector<8x512xf32>,
    %120 = vector.extract_strided_slice %1 {offsets = [4, 0], sizes = [1, 512], strides = [1, 1]} : vector<9x512xf32> to vector<1x512xf32>
    %121 = vector.broadcast %120 : vector<1x512xf32> to vector<8x512xf32>
    %122 = arith.mulf %99, %121 : vector<8x512xf32>
    %c32_46 = arith.constant 32 : index
    %c0_47 = arith.constant 0 : index
    %123 = vector.load %arg7[%c32_46, %c0_47] : memref<72x512xf32, #tpu.memory_space<vmem>>, vector<8x512xf32>
    tpu.vector_store %arg7[%c32_46, %c0_47], %122 {strides = array<i32>} : memref<72x512xf32, #tpu.memory_space<vmem>>, vector<8x512xf32>,
    %c511_i32_48 = arith.constant 511 : i32
    %124 = tpu.dynamic_rotate %99 by %c511_i32_48 dim 1 : vector<8x512xf32>, i32 -> vector<8x512xf32>
    %125 = vector.extract_strided_slice %1 {offsets = [5, 0], sizes = [1, 512], strides = [1, 1]} : vector<9x512xf32> to vector<1x512xf32>
    %126 = vector.broadcast %125 : vector<1x512xf32> to vector<8x512xf32>
    %127 = arith.mulf %124, %126 : vector<8x512xf32>
    %c40_49 = arith.constant 40 : index
    %c0_50 = arith.constant 0 : index
    %128 = vector.load %arg7[%c40_49, %c0_50] : memref<72x512xf32, #tpu.memory_space<vmem>>, vector<8x512xf32>
    tpu.vector_store %arg7[%c40_49, %c0_50], %127 {strides = array<i32>} : memref<72x512xf32, #tpu.memory_space<vmem>>, vector<8x512xf32>,
    %c497_i32_51 = arith.constant 497 : i32
    %129 = tpu.dynamic_rotate %99 by %c497_i32_51 dim 1 : vector<8x512xf32>, i32 -> vector<8x512xf32>
    %130 = vector.extract_strided_slice %1 {offsets = [6, 0], sizes = [1, 512], strides = [1, 1]} : vector<9x512xf32> to vector<1x512xf32>
    %131 = vector.broadcast %130 : vector<1x512xf32> to vector<8x512xf32>
    %132 = arith.mulf %129, %131 : vector<8x512xf32>
    %c48_52 = arith.constant 48 : index
    %c0_53 = arith.constant 0 : index
    %133 = vector.load %arg7[%c48_52, %c0_53] : memref<72x512xf32, #tpu.memory_space<vmem>>, vector<8x512xf32>
    tpu.vector_store %arg7[%c48_52, %c0_53], %132 {strides = array<i32>} : memref<72x512xf32, #tpu.memory_space<vmem>>, vector<8x512xf32>,
    %c496_i32_54 = arith.constant 496 : i32
    %134 = tpu.dynamic_rotate %99 by %c496_i32_54 dim 1 : vector<8x512xf32>, i32 -> vector<8x512xf32>
    %135 = vector.extract_strided_slice %1 {offsets = [7, 0], sizes = [1, 512], strides = [1, 1]} : vector<9x512xf32> to vector<1x512xf32>
    %136 = vector.broadcast %135 : vector<1x512xf32> to vector<8x512xf32>
    %137 = arith.mulf %134, %136 : vector<8x512xf32>
    %c56_55 = arith.constant 56 : index
    %c0_56 = arith.constant 0 : index
    %138 = vector.load %arg7[%c56_55, %c0_56] : memref<72x512xf32, #tpu.memory_space<vmem>>, vector<8x512xf32>
    tpu.vector_store %arg7[%c56_55, %c0_56], %137 {strides = array<i32>} : memref<72x512xf32, #tpu.memory_space<vmem>>, vector<8x512xf32>,
    %c495_i32_57 = arith.constant 495 : i32
    %139 = tpu.dynamic_rotate %99 by %c495_i32_57 dim 1 : vector<8x512xf32>, i32 -> vector<8x512xf32>
    %140 = vector.extract_strided_slice %1 {offsets = [8, 0], sizes = [1, 512], strides = [1, 1]} : vector<9x512xf32> to vector<1x512xf32>
    %141 = vector.broadcast %140 : vector<1x512xf32> to vector<8x512xf32>
    %142 = arith.mulf %139, %141 : vector<8x512xf32>
    %c64_58 = arith.constant 64 : index
    %c0_59 = arith.constant 0 : index
    %143 = vector.load %arg7[%c64_58, %c0_59] : memref<72x512xf32, #tpu.memory_space<vmem>>, vector<8x512xf32>
    tpu.vector_store %arg7[%c64_58, %c0_59], %142 {strides = array<i32>} : memref<72x512xf32, #tpu.memory_space<vmem>>, vector<8x512xf32>,
    %c0_60 = arith.constant 0 : index
    %c0_61 = arith.constant 0 : index
    %144 = vector.load %arg7[%c0_60, %c0_61] : memref<72x512xf32, #tpu.memory_space<vmem>>, vector<72x512xf32>
    %145 = arith.truncf %144 : vector<72x512xf32> to vector<72x512xbf16>
    %c0_62 = arith.constant 0 : index
    %c0_63 = arith.constant 0 : index
    %146 = vector.load %arg5[%c0_62, %c0_63] : memref<8x72xbf16, #tpu.memory_space<vmem>>, vector<8x72xbf16>
    %cst_64 = arith.constant dense<0.000000e+00> : vector<8x512xf32>
    %147 = tpu.matmul %146, %145, %cst_64 {dimension_numbers = #tpu.dot_dimension_numbers<[1], [0], [0], [1], [0, 0, 1, 1], [], []>} : vector<8x72xbf16>, vector<72x512xbf16>, vector<8x512xf32> -> vector<8x512xf32>
    %148 = arith.addf %147, %0 : vector<8x512xf32>
    %c0_65 = arith.constant 0 : index
    %c0_66 = arith.constant 0 : index
    %149 = vector.load %arg6[%c0_65, %c0_66] : memref<8x512xf32, #tpu.memory_space<vmem>>, vector<8x512xf32>
    tpu.vector_store %arg6[%c0_65, %c0_66], %148 {strides = array<i32>} : memref<8x512xf32, #tpu.memory_space<vmem>>, vector<8x512xf32>,
    return
  }
  func.func @transform_0(%arg0: i32) -> (i32, i32) {
    %c0_i32 = arith.constant 0 : i32
    %c0_i32_0 = arith.constant 0 : i32
    %c0_i32_1 = arith.constant 0 : i32
    return %c0_i32, %c0_i32_0 : i32, i32
  }
  func.func @transform_1(%arg0: i32) -> (i32, i32) {
    %c0_i32 = arith.constant 0 : i32
    %c0_i32_0 = arith.constant 0 : i32
    %c0_i32_1 = arith.constant 0 : i32
    return %c0_i32, %c0_i32_0 : i32, i32
  }
  func.func @transform_2(%arg0: i32) -> (i32, i32) {
    %c0_i32 = arith.constant 0 : i32
    %c0_i32_0 = arith.constant 0 : i32
    %c0_i32_1 = arith.constant 0 : i32
    return %c0_i32, %c0_i32_0 : i32, i32
  }
  func.func @transform_3(%arg0: i32) -> (i32, i32) {
    %c0_i32 = arith.constant 0 : i32
    %c0_i32_0 = arith.constant 0 : i32
    %c0_i32_1 = arith.constant 0 : i32
    return %c0_i32, %c0_i32_0 : i32, i32
  }
  func.func @transform_4(%arg0: i32) -> (i32, i32) {
    %c0_i32 = arith.constant 0 : i32
    %c0_i32_0 = arith.constant 0 : i32
    %c0_i32_1 = arith.constant 0 : i32
    return %c0_i32, %c0_i32_0 : i32, i32
  }
  func.func @transform_5(%arg0: i32) -> (i32, i32) {
    %c0_i32 = arith.constant 0 : i32
    %c0_i32_0 = arith.constant 0 : i32
    %c0_i32_1 = arith.constant 0 : i32
    return %c0_i32, %c0_i32_0 : i32, i32
  }
}

</mosaic_0001>

<bundles_post_ra>
// kernel: tpu_custom_call.1
= control target key start
LH: loop header
LB: loop body
LE: loop exit
PB: predicated region body
PF: predicated region fallthrough
CT: control target
= control target key end

     0   :  { %10 = vsyncpa [#allocation4], 0  ;;  %s1691_s0 = inlined_call_operand.hbm [shape: f32[8,512], index: 0, kind: input, shape index: {}]   ;;  %s1692_s1 = inlined_call_operand.vmem [shape: f32[8,4], index: 1, kind: input, shape index: {}]   ;;  %s1693_s2 = inlined_call_operand.hbm [shape: f32[9,512], index: 2, kind: input, shape index: {}]   ;;  %s1694_s3 = inlined_call_operand.vmem [shape: bf16[8,72], index: 3, kind: input, shape index: {}]   ;;  %s1695_s4 = inlined_call_operand.vmem [shape: bf16[8,72], index: 4, kind: input, shape index: {}]   ;;  %s1696_s5 = inlined_call_operand.hbm [shape: f32[8,512], index: 5, kind: output, shape index: {}]  }
   0x1   :  { %11 = vsyncpa [#allocation7], 0 }
   0x2   :  { %12 = vsyncpa [#allocation5], 0  ;;  %s1093_s18 = smov [#allocation3]   ;;  %s1094_s20 = smov [#allocation6]  }
   0x3   :  { %s19_s19 = sshll.u32 %s1093_s18, 4  ;;  %s30_s21 = sshll.u32 %s1094_s20, 4  ;;  %s20_s19 = int_to_ptr.vmem [resolvable:$true] %s19_s19  ;;  %s31_s21 = int_to_ptr.vmem [resolvable:$true] %s30_s21 }
   0x4   :  { %s1035_s22 = scalar_lea.vmem %s20_s19, 512  ;;  %p1040_p1 = scmp.lt.s32.totalorder %s20_s19, %s20_s19 }
   0x5   :  { %p1036_p0 = scmp.ne.s32.totalorder %s20_s19, %s1035_s22  ;;  %p1041_p2 = scmp.lt.s32.totalorder %s1035_s22, %s1035_s22 }
   0x7   :  { %p1042_p3 = por %p1041_p2, %p1040_p1 }
   0x9   :  { %p1043_p4 = pnand %p1042_p3, %p1036_p0 }
   0xb   :  { %1046 = shalt.err (!%p1043_p4)
}
   0xc   :  { %22 = dma.hbm_to_vmem [thread:$0]  %s1691_s0, 512, %s20_s19, [#allocation4]  }
   0xd   :  { %s1055_s25 = scalar_lea.vmem %s31_s21, 1024  ;;  %p1060_p6 = scmp.lt.s32.totalorder %s31_s21, %s31_s21 }
   0xe   :  { %p1056_p5 = scmp.ne.s32.totalorder %s31_s21, %s1055_s25  ;;  %p1061_p7 = scmp.lt.s32.totalorder %s1055_s25, %s1055_s25 }
  0x10   :  { %p1062_p8 = por %p1061_p7, %p1060_p6 }
  0x12   :  { %p1063_p9 = pnand %p1062_p8, %p1056_p5 }
  0x14   :  { %1066 = shalt.err (!%p1063_p9)
}
  0x15   :  { %s1095_s26 = smov 512   ;;  %s1096_s27 = smov 32  }
  0x16   :  { %36 = dma.hbm_to_vmem [thread:$0]  %s1693_s2, 1024, %s31_s21, [#allocation7], %s1095_s26, %s1095_s26, %s1096_s27  }
  0x17   :  { %1087 = dma.done.wait [#allocation4], 512  }
  0x18   :  { %1088 = vsyncadd [#allocation4], 4294966784 }
  0x19   :  { %1089 = dma.done.wait [#allocation7], 1024  }
  0x1a   :  { %1090 = vsyncadd [#allocation7], 4294966272  ;;  %v48_v0 = vld [vmem:[#allocation3] sm:$0xff]  ;;  %v49_v1 = vld [vmem:[#allocation3 + $0x8] sm:$0xff]  ;;  %v1097_v20 = vmov 0   ;;  %v1098_v24 = vmov 1   ;;  %v121_v45 = vlaneseq }
  0x1b   :  { %v50_v2 = vld [vmem:[#allocation3 + $0x10] sm:$0xff]  ;;  %v61_v3 = vadd.f32 %v49_v1, %v48_v0  ;;  %v51_v4 = vld [vmem:[#allocation3 + $0x18] sm:$0xff]  ;;  %1014 = vset.pattern.permute.xlu1 %v1097_v20  ;;  %541 = vmatprep.mubr.bf16.mxu0 %v1097_v20  ;;  %v1152_v25 = vld [vmem:[%s1692_s1] sm:$0xff]  ;;  %s1099_s30 = smov 1   ;;  %s1100_s1 = smov 127   ;;  %vm496_vm1 = vcmask 1043456  }
  0x1c   :  { %582 = vmatprep.mubr.bf16.mxu1 %v1097_v20  ;;  %1015 = vset.pattern.permute.xlu0 %v1098_v24  ;;  %s1101_s6 = smov 111   ;;  %s1102_s7 = smov 112   ;;  %v1229_v46 = vand.u32 127, %v121_v45  ;;  %v1232_v48 = vld [vmem:[#allocation6 + $0x20] ss:$0 sm:$0xff]  ;;  %v1246_v61 = vshrl.u32 %v121_v45, 7 }
  0x1d   :  { %v62_v5 = vadd.f32 %v61_v3, %v50_v2  ;;  %s1103_s8 = smov 15   ;;  %s1104_s9 = smov 113   ;;  %v1237_v52 = vld [vmem:[#allocation6 + $0x28] ss:$0 sm:$0xff]  ;;  %v1281_v24 = vld [vmem:[#allocation6] sm:$0xff]  ;;  %vm492_vm9 = vcmask 588800  }
  0x1e   :  { %s1105_s10 = smov 17   ;;  %s1106_s11 = smov 16   ;;  %vm406_vm0 = vcmp.lt.s32.totalorder %v1229_v46, 111  ;;  %v339_v63 = vsub.s32 6, %v1246_v61  ;;  %vm332_vm2 = vcmp.lt.s32.totalorder %v1229_v46, 113  ;;  %vm369_vm3 = vcmp.lt.s32.totalorder %v1229_v46, 112 }
  0x1f   :  { %v63_v6 = vadd.f32 %v62_v5, %v51_v4  ;;  %vm295_vm4 = vcmp.lt.s32.totalorder %v1229_v46, 127  ;;  %vm197_vm5 = vcmp.lt.s32.totalorder %v1229_v46, 15  ;;  %vm234_vm6 = vcmp.lt.s32.totalorder %v1229_v46, 1  ;;  %s1109_s15 = smov [#allocation8]  }
  0x20   :  { %vm123_vm7 = vcmp.lt.s32.totalorder %v1229_v46, 17  ;;  %vm160_vm8 = vcmp.lt.s32.totalorder %v1229_v46, 16  ;;  %s975_s16 = sshll.u32 %s1109_s15, 4  ;;  %s976_s16 = int_to_ptr.vmem [resolvable:$true] %s975_s16 }
  0x21   :  { %64 = vadd.xlane.f32.xlu0 %v63_v6  ;;  %p1072_p11 = scmp.lt.s32.totalorder %s976_s16, %s976_s16 }
  0xaa   :  { %v65_v7 = vpop.xlane.xlu0 %64 }
  0xab   :  { %v67_v8 = vmul.f32 0.001953125, %v65_v7 }
  0xad   :  { %v68_v9 = vsub.f32 %v48_v0, %v67_v8  ;;  %v69_v10 = vsub.f32 %v49_v1, %v67_v8  ;;  %v70_v11 = vsub.f32 %v50_v2, %v67_v8  ;;  %v71_v12 = vsub.f32 %v51_v4, %v67_v8 }
  0xaf   :  { %v72_v13 = vmul.f32 %v68_v9, %v68_v9  ;;  %v73_v14 = vmul.f32 %v69_v10, %v69_v10  ;;  %v74_v15 = vmul.f32 %v70_v11, %v70_v11  ;;  %v75_v17 = vmul.f32 %v71_v12, %v71_v12  ;;  %v1269_v11 = vld [vmem:[#allocation6 + $0x30] ss:$0 sm:$0xff]  ;;  %v1271_v12 = vld [vmem:[#allocation6 + $0x38] ss:$0 sm:$0xff] }
  0xb1   :  { %v76_v16 = vadd.f32 %v73_v14, %v72_v13 }
  0xb3   :  { %v77_v18 = vadd.f32 %v76_v16, %v74_v15 }
  0xb5   :  { %v78_v19 = vadd.f32 %v77_v18, %v75_v17 }
  0xb7   :  { %79 = vadd.xlane.f32.xlu0 %v78_v19 }
 0x140   :  { %v80_v21 = vpop.xlane.xlu0 %79 }
 0x141   :  { %v81_v22 = vmul.f32 0.001953125, %v80_v21 }
 0x143   :  { %v82_v23 = vadd.f32 1e-05, %v81_v22 }
 0x145   :  { %1019 = vrsqrt.f32 %v82_v23 }
 0x152   :  { %v1020_v26 = vpop.eup %1019 }
 0x153   :  { %v84_v27 = vmul.f32 %v1020_v26, %v1152_v25  ;;  %v265_v26 = vsub.s32 4, %v1246_v61 }
 0x155   :  { %v85_v28 = vmul.f32 %v84_v27, %v67_v8 }
 0x157   :  { %87 = vrot.lane.b32.xlu1 %v85_v28, %s1099_s30  ;;  %v1287_v28 = vrot.slane %v1281_v24, %v339_v63 }
 0x15b   :  { %93 = vperm.xlu1 %1014, %v84_v27  }
 0x1c9   :  { %v88_v29 = vpop.permute.xlu1 %87 }
 0x1ca   :  { %v90_v30 = vsub.f32 %v1152_v25, %v88_v29 }
 0x1cc   :  { %102 = vperm.xlu0 %1015, %v90_v30  }
 0x1d6   :  { %v94_v31 = vpop.permute.xlu1 %93 }
 0x1d7   :  { %v96_v32 = vmul.f32 %v94_v31, %v48_v0  ;;  %v98_v33 = vmul.f32 %v94_v31, %v50_v2  ;;  %v97_v35 = vmul.f32 %v94_v31, %v49_v1  ;;  %v99_v36 = vmul.f32 %v94_v31, %v51_v4  ;;  %v1253_v2 = vld [vmem:[#allocation6 + $0x8] sm:$0xff] }
 0x1d8   :  { %v376_v0 = vsub.s32 7, %v1246_v61  ;;  %v1256_v4 = vrot.slane %v1253_v2, %v339_v63 }
 0x1da   :  { %v1260_v5 = vrot.slane %v1253_v2, %v376_v0  ;;  %v1292_v30 = vrot.slane %v1281_v24, %v376_v0 }
 0x247   :  { %v103_v34 = vpop.permute.xlu0 %102 }
 0x248   :  { %v105_v37 = vadd.f32 %v103_v34, %v96_v32  ;;  %v107_v38 = vadd.f32 %v103_v34, %v98_v33  ;;  %v106_v39 = vadd.f32 %v103_v34, %v97_v35  ;;  %v108_v40 = vadd.f32 %v103_v34, %v99_v36 }
 0x249   :  { %v302_v32 = vsub.s32 5, %v1246_v61  ;;  %v1300_v35 = vrot.slane %v1253_v2, %v265_v26 }
 0x24a   :  { %v1157_v41 = vmax.f32 %v105_v37, 0.0  ;;  %v1159_v42 = vmax.f32 %v107_v38, 0.0  ;;  %v1165_v43 = vmax.f32 %v106_v39, 0.0  ;;  %v1167_v44 = vmax.f32 %v108_v40, 0.0  ;;  %v1307_v39 = vld [vmem:[#allocation6 + $0x10] sm:$0xff] }
 0x24b   :  { %v1305_v38 = vrot.slane %v1253_v2, %v302_v32 }
 0x24c   :  { %291 = vrot.lane.b32.xlu0 %v1159_v42, %s1100_s1  ;;  %398 = vrot.lane.b32.xlu1 %v1157_v41, %s1101_s6 }
 0x250   :  { %367 = vrot.lane.b32.xlu0 %v1167_v44, %s1102_s7  ;;  %400 = vrot.lane.b32.xlu1 %v1165_v43, %s1101_s6 }
 0x254   :  { %189 = vrot.lane.b32.xlu0 %v1157_v41, %s1103_s8  ;;  %402 = vrot.lane.b32.xlu1 %v1159_v42, %s1101_s6 }
 0x258   :  { %226 = vrot.lane.b32.xlu0 %v1157_v41, %s1099_s30  ;;  %326 = vrot.lane.b32.xlu1 %v1165_v43, %s1104_s9 }
 0x25c   :  { %293 = vrot.lane.b32.xlu0 %v1167_v44, %s1100_s1  ;;  %328 = vrot.lane.b32.xlu1 %v1159_v42, %s1104_s9 }
 0x260   :  { %232 = vrot.lane.b32.xlu0 %v1167_v44, %s1099_s30  ;;  %363 = vrot.lane.b32.xlu1 %v1165_v43, %s1102_s7 }
 0x264   :  { %115 = vrot.lane.b32.xlu0 %v1165_v43, %s1105_s10  ;;  %365 = vrot.lane.b32.xlu1 %v1159_v42, %s1102_s7 }
 0x268   :  { %154 = vrot.lane.b32.xlu0 %v1165_v43, %s1106_s11  ;;  %404 = vrot.lane.b32.xlu1 %v1167_v44, %s1101_s6 }
 0x26c   :  { %230 = vrot.lane.b32.xlu0 %v1159_v42, %s1099_s30  ;;  %324 = vrot.lane.b32.xlu1 %v1157_v41, %s1104_s9 }
 0x270   :  { %158 = vrot.lane.b32.xlu0 %v1167_v44, %s1106_s11  ;;  %361 = vrot.lane.b32.xlu1 %v1157_v41, %s1102_s7 }
 0x274   :  { %156 = vrot.lane.b32.xlu0 %v1159_v42, %s1106_s11  ;;  %289 = vrot.lane.b32.xlu1 %v1165_v43, %s1100_s1 }
 0x278   :  { %330 = vrot.lane.b32.xlu1 %v1167_v44, %s1104_s9 }
 0x27c   :  { %287 = vrot.lane.b32.xlu1 %v1157_v41, %s1100_s1 }
 0x280   :  { %191 = vrot.lane.b32.xlu1 %v1165_v43, %s1103_s8 }
 0x284   :  { %228 = vrot.lane.b32.xlu1 %v1165_v43, %s1099_s30 }
 0x288   :  { %195 = vrot.lane.b32.xlu1 %v1167_v44, %s1103_s8 }
 0x28c   :  { %113 = vrot.lane.b32.xlu1 %v1157_v41, %s1105_s10 }
 0x290   :  { %152 = vrot.lane.b32.xlu1 %v1157_v41, %s1106_s11 }
 0x294   :  { %193 = vrot.lane.b32.xlu1 %v1159_v42, %s1103_s8 }
 0x298   :  { %119 = vrot.lane.b32.xlu1 %v1167_v44, %s1105_s10 }
 0x29c   :  { %117 = vrot.lane.b32.xlu1 %v1159_v42, %s1105_s10 }
 0x2be   :  { %v399_v47 = vpop.permute.xlu1 %398  ;;  %v1244_v60 = vpop.permute.xlu0 %291 }
 0x2c2   :  { %v401_v49 = vpop.permute.xlu1 %400  ;;  %v368_v3 = vpop.permute.xlu0 %367 }
 0x2c3   :  { %v409_v50 = vsel %vm406_vm0, %v399_v47, %v401_v49 }
 0x2c4   :  { %v427_v51 = vmul.f32 %v1232_v48, %v409_v50  ;;  %v1313_v50 = vld [vmem:[#allocation6 + $0x18] sm:$0xff] }
 0x2c6   :  { %v403_v53 = vpop.permute.xlu1 %402  ;;  %v487_v56 = vpack.c.bf16 %v427_v51, %v427_v51  ;;  %v1273_v13 = vpop.permute.xlu0 %189 }
 0x2c7   :  { %v408_v54 = vsel %vm406_vm0, %v401_v49, %v403_v53  ;;  %v1311_v49 = vrot.slane %v1307_v39, %v376_v0 }
 0x2c8   :  { %v428_v55 = vmul.f32 %v1237_v52, %v408_v54  ;;  %v498_v59 = vsel %vm496_vm1, %v487_v56, 0  ;;  %v1321_v54 = vrot.slane %v1313_v50, %v376_v0  ;;  %v1325_v56 = vrot.slane %v1307_v39, %v339_v63 }
 0x2c9   :  { %v1338_v0 = vrot.slane %v1307_v39, %v302_v32 }
 0x2ca   :  { %v327_v57 = vpop.permute.xlu1 %326  ;;  %v488_v58 = vpack.c.bf16 %v428_v55, %v428_v55  ;;  %v1284_v27 = vpop.permute.xlu0 %226 }
 0x2cc   :  { %989 = vmatprep.subr.msk.bf16.mxu0 %vm496_vm1, %v488_v58 }
 0x2cd   :  { %516 = vmatpush1.bf16.msra.mxu0 %v498_v59 }
 0x2ce   :  { %v1248_v62 = vpop.permute.xlu1 %328  ;;  %v294_v40 = vpop.permute.xlu0 %293 }
 0x2cf   :  { %v334_v6 = vsel %vm332_vm2, %v327_v57, %v1248_v62 }
 0x2d0   :  { %v354_v9 = vmul.f32 %v1256_v4, %v334_v6 }
 0x2d2   :  { %v364_v1 = vpop.permute.xlu1 %363 }
 0x2d6   :  { %v366_v7 = vpop.permute.xlu1 %365 }
 0x2d7   :  { %v371_v8 = vsel %vm369_vm3, %v364_v1, %v366_v7  ;;  %v370_v58 = vsel %vm369_vm3, %v366_v7, %v368_v3  ;;  %v296_v7 = vsel %vm295_vm4, %v1244_v60, %v294_v40 }
 0x2d8   :  { %v391_v10 = vmul.f32 %v1260_v5, %v371_v8  ;;  %v1341_v8 = vrot.slane %v1281_v24, %v302_v32 }
 0x2da   :  { %v405_v14 = vpop.permute.xlu1 %404  ;;  %v484_v15 = vpack.c.bf16 %v391_v10, %v354_v9  ;;  %v1355_v10 = vrot.slane %v1313_v50, %v302_v32 }
 0x2db   :  { %v407_v16 = vsel %vm406_vm0, %v403_v53, %v405_v14  ;;  %v410_v17 = vsel %vm406_vm0, %v405_v14, %v399_v47  ;;  %v280_v53 = vmul.f32 %v1300_v35, %v1165_v43  ;;  %v1335_v43 = vrot.slane %v1281_v24, %v265_v26  ;;  %v1357_v14 = vpop.permute.xlu0 %232 }
 0x2dc   :  { %v429_v18 = vmul.f32 %v1269_v11, %v407_v16  ;;  %517 = vmatprep.subr.bf16.mxu0 %v484_v15  ;;  %v430_v19 = vmul.f32 %v1271_v12, %v410_v17  ;;  %v392_v15 = vmul.f32 %v1311_v49, %v370_v58 }
 0x2de   :  { %v325_v21 = vpop.permute.xlu1 %324  ;;  %v490_v22 = vpack.c.bf16 %v430_v19, %v430_v19  ;;  %v489_v23 = vpack.c.bf16 %v429_v18, %v429_v18  ;;  %v1364_v18 = vrot.slane %v1307_v39, %v265_v26 }
 0x2df   :  { %v335_v31 = vsel %vm332_vm2, %v325_v21, %v327_v57  ;;  %v1328_v57 = vrot.slane %v1313_v50, %v339_v63  ;;  %v1344_v63 = vrot.slane %v1313_v50, %v265_v26  ;;  %v204_v26 = vsub.s32 2, %v1246_v61 }
 0x2e0   :  { %991 = vmatprep.subr.msk.bf16.mxu1 %vm496_vm1, %v490_v22  ;;  %v504_v29 = vsel %vm496_vm1, %v489_v23, 0  ;;  %v353_v36 = vmul.f32 %v1287_v28, %v335_v31  ;;  %v318_v22 = vmul.f32 %v1338_v0, %v296_v7  ;;  %v279_v31 = vmul.f32 %v1335_v43, %v1157_v41 }
 0x2e1   :  { %557 = vmatpush1.bf16.msra.mxu1 %v504_v29 }
 0x2e2   :  { %v362_v33 = vpop.permute.xlu1 %361 }
 0x2e3   :  { %v372_v34 = vsel %vm369_vm3, %v362_v33, %v364_v1  ;;  %v373_v59 = vsel %vm369_vm3, %v368_v3, %v362_v33 }
 0x2e4   :  { %v390_v37 = vmul.f32 %v1292_v30, %v372_v34  ;;  %v393_v16 = vmul.f32 %v1321_v54, %v373_v59  ;;  %v282_v34 = vmul.f32 %v1344_v63, %v1167_v44 }
 0x2e6   :  { %v290_v45 = vpop.permute.xlu1 %289  ;;  %v483_v47 = vpack.c.bf16 %v390_v37, %v353_v36  ;;  %v281_v36 = vmul.f32 %v1364_v18, %v1159_v42  ;;  %v241_v37 = vsub.s32 3, %v1246_v61 }
 0x2e7   :  { %v297_v51 = vsel %vm295_vm4, %v290_v45, %v1244_v60 }
 0x2e8   :  { %v317_v55 = vmul.f32 %v1305_v38, %v297_v51  ;;  %518 = vmatpush1.bf16.msra.mxu0 %v483_v47  ;;  %v481_v51 = vpack.c.bf16 %v318_v22, %v281_v36  ;;  %v1388_v44 = vrot.slane %v1253_v2, %v241_v37  ;;  %v1398_v59 = vrot.slane %v1281_v24, %v241_v37 }
 0x2e9   :  { %v167_v22 = vsub.s32 1, %v1246_v61 }
 0x2ea   :  { %v331_v1 = vpop.permute.xlu1 %330  ;;  %v480_v6 = vpack.c.bf16 %v317_v55, %v280_v53  ;;  %v1385_v53 = vrot.slane %v1253_v2, %v204_v26 }
 0x2eb   :  { %v333_v3 = vsel %vm332_vm2, %v1248_v62, %v331_v1  ;;  %v336_v9 = vsel %vm332_vm2, %v331_v1, %v325_v21 }
 0x2ec   :  { %v355_v17 = vmul.f32 %v1325_v56, %v333_v3  ;;  %v356_v60 = vmul.f32 %v1328_v57, %v336_v9  ;;  %519 = vmatprep.subr.bf16.mxu0 %v480_v6  ;;  %v1403_v3 = vrot.slane %v1281_v24, %v204_v26  ;;  %v238_v9 = vsel %vm234_vm6, %v1357_v14, %v1284_v27 }
 0x2ee   :  { %v288_v62 = vpop.permute.xlu1 %287  ;;  %v486_v19 = vpack.c.bf16 %v393_v16, %v356_v60  ;;  %v485_v21 = vpack.c.bf16 %v392_v15, %v355_v17  ;;  %v255_v60 = vmul.f32 %v1398_v59, %v238_v9 }
 0x2ef   :  { %v298_v23 = vsel %vm295_vm4, %v288_v62, %v290_v45  ;;  %v299_v29 = vsel %vm295_vm4, %v294_v40, %v288_v62  ;;  %v1381_v40 = vpop.permute.xlu0 %115 }
 0x2f0   :  { %v316_v32 = vmul.f32 %v1341_v8, %v298_v23  ;;  %v319_v33 = vmul.f32 %v1355_v10, %v299_v29  ;;  %558 = vmatprep.subr.bf16.mxu1 %v486_v19  ;;  %v130_v19 = vsub.s32 0, %v1246_v61  ;;  %v1428_v61 = vrot.slane %v1313_v50, %v241_v37 }
 0x2f1   :  { %559 = vmatpush1.bf16.msra.mxu1 %v485_v21 }
 0x2f2   :  { %v192_v41 = vpop.permute.xlu1 %191  ;;  %v479_v45 = vpack.c.bf16 %v316_v32, %v279_v31  ;;  %v482_v47 = vpack.c.bf16 %v319_v33, %v282_v34  ;;  %v1418_v29 = vrot.slane %v1253_v2, %v130_v19  ;;  %v1431_v33 = vrot.slane %v1307_v39, %v241_v37 }
 0x2f3   :  { %v200_v42 = vsel %vm197_vm5, %v1273_v13, %v192_v41  ;;  %v155_v1 = vpop.permute.xlu0 %154 }
 0x2f4   :  { %520 = vmatpush1.bf16.msra.mxu0 %v479_v45  ;;  %560 = vmatprep.subr.bf16.mxu1 %v482_v47  ;;  %v219_v6 = vmul.f32 %v1385_v53, %v200_v42  ;;  %v1438_v47 = vrot.slane %v1307_v39, %v204_v26 }
 0x2f5   :  { %561 = vmatpush1.bf16.msra.mxu1 %v481_v51  ;;  %v1441_v51 = vrot.slane %v1313_v50, %v204_v26  ;;  %v1456_v26 = vrot.slane %v1281_v24, %v130_v19 }
 0x2f6   :  { %v229_v55 = vpop.permute.xlu1 %228 }
 0x2f7   :  { %v237_v58 = vsel %vm234_vm6, %v1284_v27, %v229_v55  ;;  %v231_v21 = vpop.permute.xlu0 %230 }
 0x2f8   :  { %v256_v7 = vmul.f32 %v1388_v44, %v237_v58  ;;  %v235_v42 = vsel %vm234_vm6, %v231_v21, %v1357_v14  ;;  %v236_v37 = vsel %vm234_vm6, %v229_v55, %v231_v21 }
 0x2f9   :  { %v257_v14 = vmul.f32 %v1431_v33, %v236_v37 }
 0x2fa   :  { %v196_v15 = vpop.permute.xlu1 %195  ;;  %v476_v16 = vpack.c.bf16 %v256_v7, %v219_v6  ;;  %v1449_v7 = vrot.slane %v1281_v24, %v167_v22  ;;  %v1468_v24 = vrot.slane %v1313_v50, %v167_v22 }
 0x2fb   :  { %v201_v17 = vsel %vm197_vm5, %v196_v15, %v1273_v13  ;;  %v1421_v13 = vrot.slane %v1253_v2, %v167_v22  ;;  %v159_v36 = vpop.permute.xlu0 %158 }
 0x2fc   :  { %v218_v62 = vmul.f32 %v1403_v3, %v201_v17  ;;  %521 = vmatprep.subr.bf16.mxu0 %v476_v16  ;;  %v258_v17 = vmul.f32 %v1428_v61, %v235_v42  ;;  %v1478_v42 = vrot.slane %v1313_v50, %v130_v19 }
 0x2fe   :  { %v114_v23 = vpop.permute.xlu1 %113  ;;  %v475_v27 = vpack.c.bf16 %v255_v60, %v218_v62 }
 0x2ff   :  { %v126_v31 = vsel %vm123_vm7, %v114_v23, %v1381_v40  ;;  %v157_v21 = vpop.permute.xlu0 %156 }
 0x300   :  { %522 = vmatpush1.bf16.msra.mxu0 %v475_v27  ;;  %v145_v2 = vmul.f32 %v1418_v29, %v126_v31  ;;  %v161_v37 = vsel %vm160_vm8, %v157_v21, %v159_v36 }
 0x302   :  { %v153_v32 = vpop.permute.xlu1 %152 }
 0x303   :  { %v163_v34 = vsel %vm160_vm8, %v153_v32, %v155_v1  ;;  %v164_v62 = vsel %vm160_vm8, %v159_v36, %v153_v32  ;;  %v1475_v32 = vrot.slane %v1307_v39, %v130_v19  ;;  %v184_v19 = vmul.f32 %v1468_v24, %v161_v37 }
 0x304   :  { %v182_v45 = vmul.f32 %v1421_v13, %v163_v34 }
 0x306   :  { %v194_v58 = vpop.permute.xlu1 %193  ;;  %v472_v6 = vpack.c.bf16 %v182_v45, %v145_v2  ;;  %v181_v2 = vmul.f32 %v1449_v7, %v164_v62 }
 0x307   :  { %v198_v9 = vsel %vm197_vm5, %v194_v58, %v196_v15  ;;  %v199_v16 = vsel %vm197_vm5, %v192_v41, %v194_v58  ;;  %v1465_v41 = vrot.slane %v1307_v39, %v167_v22  ;;  %v162_v22 = vsel %vm160_vm8, %v155_v1, %v157_v21  ;;  %v491_v1 = vld [vmem:[%s1694_s3] sm:$0xf] }
 0x308   :  { %v220_v55 = vmul.f32 %v1438_v47, %v199_v16  ;;  %v221_v60 = vmul.f32 %v1441_v51, %v198_v9  ;;  %523 = vmatprep.subr.bf16.mxu0 %v472_v6 }
 0x309   :  { %v183_v50 = vmul.f32 %v1465_v41, %v162_v22 }
 0x30a   :  { %v120_v15 = vpop.permute.xlu1 %119  ;;  %v478_v27 = vpack.c.bf16 %v258_v17, %v221_v60  ;;  %v477_v31 = vpack.c.bf16 %v257_v14, %v220_v55 }
 0x30b   :  { %v127_v34 = vsel %vm123_vm7, %v120_v15, %v114_v23 }
 0x30c   :  { %v144_v45 = vmul.f32 %v1456_v26, %v127_v34  ;;  %562 = vmatprep.subr.bf16.mxu1 %v478_v27 }
 0x30d   :  { %563 = vmatpush1.bf16.msra.mxu1 %v477_v31 }
 0x30e   :  { %v118_v58 = vpop.permute.xlu1 %117  ;;  %v471_v23 = vpack.c.bf16 %v181_v2, %v144_v45 }
 0x30f   :  { %v124_v6 = vsel %vm123_vm7, %v118_v58, %v120_v15  ;;  %v125_v39 = vsel %vm123_vm7, %v1381_v40, %v118_v58 }
 0x310   :  { %v146_v36 = vmul.f32 %v1475_v32, %v125_v39  ;;  %v147_v9 = vmul.f32 %v1478_v42, %v124_v6  ;;  %524 = vmatpush1.bf16.msra.mxu0 %v471_v23 }
 0x312   :  { %v474_v16 = vpack.c.bf16 %v184_v19, %v147_v9  ;;  %v473_v17 = vpack.c.bf16 %v183_v50, %v146_v36 }
 0x313   :  { %990 = vmatmul.mubr.msk.bf16.vlgmr.msra.gmra.mxu0 %vm492_vm9, %v491_v1 }
 0x314   :  { %564 = vmatprep.subr.bf16.mxu1 %v474_v16  ;;  %915 = vmatprep.mubr.bf16.mxu0 %v1097_v20  ;;  %v1107_v16 = vmov 2  }
 0x315   :  { %565 = vmatpush1.bf16.msra.mxu1 %v473_v17  ;;  %1016 = vset.pattern.permute.xlu1 %v1107_v16 }
 0x318   :  { %992 = vmatmul.mubr.msk.bf16.vlgmr.msra.gmra.mxu1 %vm492_vm9, %v491_v1 }
 0x319   :  { %956 = vmatprep.mubr.bf16.mxu1 %v1097_v20 }
 0x3d3   :  { %v543_v40 = vpop.f32.mrf.mxu0 }
 0x3d5   :  { %v545_v14 = vpop.f32.mrf.mxu0 }
 0x3d6   :  { %v592_v55 = vadd.f32 %v545_v14, %v543_v40 }
 0x3d7   :  { %v547_v60 = vpop.f32.mrf.mxu0 }
 0x3d8   :  { %v584_v62 = vpop.f32.mrf.mxu1 }
 0x3d9   :  { %v548_v21 = vpop.f32.mrf.mxu0  ;;  %v593_v15 = vadd.f32 %v592_v55, %v584_v62 }
 0x3da   :  { %v586_v27 = vpop.f32.mrf.mxu1  ;;  %v1108_v21 = vmov 3  }
 0x3db   :  { %v594_v31 = vadd.f32 %v593_v15, %v586_v27  ;;  %1018 = vset.pattern.permute.xlu0 %v1108_v21 }
 0x3dc   :  { %v588_v34 = vpop.f32.mrf.mxu1 }
 0x3dd   :  { %595 = vadd.xlane.f32.xlu1 %v594_v31 }
 0x3de   :  { %v589_v2 = vpop.f32.mrf.mxu1 }
 0x466   :  { %v596_v45 = vpop.xlane.xlu1 %595 }
 0x467   :  { %v597_v37 = vmul.f32 0.001953125, %v596_v45 }
 0x469   :  { %v598_v22 = vsub.f32 %v543_v40, %v597_v37  ;;  %v599_v58 = vsub.f32 %v545_v14, %v597_v37  ;;  %v600_v23 = vsub.f32 %v584_v62, %v597_v37  ;;  %v601_v6 = vsub.f32 %v586_v27, %v597_v37 }
 0x46b   :  { %v602_v39 = vmul.f32 %v598_v22, %v598_v22  ;;  %v603_v20 = vmul.f32 %v599_v58, %v599_v58  ;;  %v604_v50 = vmul.f32 %v600_v23, %v600_v23  ;;  %v605_v36 = vmul.f32 %v601_v6, %v601_v6 }
 0x46d   :  { %v606_v19 = vadd.f32 %v603_v20, %v602_v39 }
 0x46f   :  { %v607_v9 = vadd.f32 %v606_v19, %v604_v50 }
 0x471   :  { %v608_v1 = vadd.f32 %v607_v9, %v605_v36 }
 0x473   :  { %609 = vadd.xlane.f32.xlu0 %v608_v1 }
 0x4fc   :  { %v610_v17 = vpop.xlane.xlu0 %609 }
 0x4fd   :  { %v611_v55 = vmul.f32 0.001953125, %v610_v17 }
 0x4ff   :  { %v612_v60 = vadd.f32 1e-05, %v611_v55 }
 0x501   :  { %1021 = vrsqrt.f32 %v612_v60 }
 0x50e   :  { %v1022_v15 = vpop.eup %1021 }
 0x50f   :  { %v614_v31 = vmul.f32 %v1022_v15, %v1152_v25 }
 0x511   :  { %623 = vperm.xlu1 %1016, %v614_v31   ;;  %v615_v34 = vmul.f32 %v614_v31, %v597_v37 }
 0x513   :  { %617 = vrot.lane.b32.xlu0 %v615_v34, %s1099_s30 }
 0x515   :  { %1017 = vset.pattern.permute.xlu1 %v1108_v21 }
 0x585   :  { %v618_v2 = vpop.permute.xlu0 %617 }
 0x586   :  { %v620_v45 = vsub.f32 %v1152_v25, %v618_v2 }
 0x588   :  { %632 = vperm.xlu1 %1017, %v620_v45  }
 0x58c   :  { %v624_v22 = vpop.permute.xlu1 %623 }
 0x58d   :  { %v626_v58 = vmul.f32 %v624_v22, %v543_v40  ;;  %v627_v23 = vmul.f32 %v624_v22, %v545_v14  ;;  %v628_v39 = vmul.f32 %v624_v22, %v584_v62  ;;  %v629_v20 = vmul.f32 %v624_v22, %v586_v27 }
 0x603   :  { %v633_v6 = vpop.permute.xlu1 %632 }
 0x604   :  { %v635_v50 = vadd.f32 %v633_v6, %v626_v58  ;;  %v636_v19 = vadd.f32 %v633_v6, %v627_v23  ;;  %v637_v36 = vadd.f32 %v633_v6, %v628_v39  ;;  %v638_v9 = vadd.f32 %v633_v6, %v629_v20 }
 0x606   :  { %v1503_v1 = vmax.f32 %v635_v50, 0.0  ;;  %v1505_v37 = vmax.f32 %v636_v19, 0.0  ;;  %v1511_v25 = vmax.f32 %v637_v36, 0.0  ;;  %v1513_v40 = vmax.f32 %v638_v9, 0.0 }
 0x608   :  { %793 = vrot.lane.b32.xlu1 %v1505_v37, %s1101_s6  ;;  %791 = vrot.lane.b32.xlu0 %v1503_v1, %s1101_s6 }
 0x60c   :  { %797 = vrot.lane.b32.xlu1 %v1513_v40, %s1101_s6  ;;  %795 = vrot.lane.b32.xlu0 %v1511_v25, %s1101_s6 }
 0x610   :  { %753 = vrot.lane.b32.xlu1 %v1505_v37, %s1104_s9  ;;  %751 = vrot.lane.b32.xlu0 %v1503_v1, %s1104_s9 }
 0x614   :  { %757 = vrot.lane.b32.xlu1 %v1513_v40, %s1104_s9  ;;  %755 = vrot.lane.b32.xlu0 %v1511_v25, %s1104_s9 }
 0x618   :  { %773 = vrot.lane.b32.xlu1 %v1505_v37, %s1102_s7  ;;  %771 = vrot.lane.b32.xlu0 %v1503_v1, %s1102_s7 }
 0x61c   :  { %777 = vrot.lane.b32.xlu1 %v1513_v40, %s1102_s7  ;;  %775 = vrot.lane.b32.xlu0 %v1511_v25, %s1102_s7 }
 0x620   :  { %733 = vrot.lane.b32.xlu1 %v1505_v37, %s1100_s1  ;;  %731 = vrot.lane.b32.xlu0 %v1503_v1, %s1100_s1 }
 0x624   :  { %737 = vrot.lane.b32.xlu1 %v1513_v40, %s1100_s1  ;;  %735 = vrot.lane.b32.xlu0 %v1511_v25, %s1100_s1 }
 0x628   :  { %685 = vrot.lane.b32.xlu1 %v1505_v37, %s1103_s8  ;;  %683 = vrot.lane.b32.xlu0 %v1503_v1, %s1103_s8 }
 0x62c   :  { %689 = vrot.lane.b32.xlu1 %v1513_v40, %s1103_s8  ;;  %687 = vrot.lane.b32.xlu0 %v1511_v25, %s1103_s8 }
 0x630   :  { %705 = vrot.lane.b32.xlu1 %v1505_v37, %s1099_s30  ;;  %703 = vrot.lane.b32.xlu0 %v1503_v1, %s1099_s30 }
 0x634   :  { %709 = vrot.lane.b32.xlu1 %v1513_v40, %s1099_s30  ;;  %707 = vrot.lane.b32.xlu0 %v1511_v25, %s1099_s30 }
 0x638   :  { %645 = vrot.lane.b32.xlu1 %v1505_v37, %s1105_s10  ;;  %643 = vrot.lane.b32.xlu0 %v1503_v1, %s1105_s10 }
 0x63c   :  { %649 = vrot.lane.b32.xlu1 %v1513_v40, %s1105_s10  ;;  %647 = vrot.lane.b32.xlu0 %v1511_v25, %s1105_s10 }
 0x640   :  { %665 = vrot.lane.b32.xlu1 %v1505_v37, %s1106_s11  ;;  %663 = vrot.lane.b32.xlu0 %v1503_v1, %s1106_s11 }
 0x644   :  { %669 = vrot.lane.b32.xlu1 %v1513_v40, %s1106_s11  ;;  %667 = vrot.lane.b32.xlu0 %v1511_v25, %s1106_s11 }
 0x67a   :  { %v794_v14 = vpop.permute.xlu1 %793  ;;  %v792_v62 = vpop.permute.xlu0 %791 }
 0x67b   :  { %v801_v27 = vsel %vm406_vm0, %v792_v62, %v794_v14 }
 0x67c   :  { %v803_v16 = vmul.f32 %v1232_v48, %v801_v27 }
 0x67e   :  { %v798_v17 = vpop.permute.xlu1 %797  ;;  %v796_v55 = vpop.permute.xlu0 %795  ;;  %v863_v31 = vpack.c.bf16 %v803_v16, %v803_v16 }
 0x67f   :  { %v802_v60 = vsel %vm406_vm0, %v798_v17, %v792_v62  ;;  %v799_v21 = vsel %vm406_vm0, %v796_v55, %v798_v17  ;;  %v800_v15 = vsel %vm406_vm0, %v794_v14, %v796_v55 }
 0x680   :  { %v806_v34 = vmul.f32 %v1271_v12, %v802_v60  ;;  %v804_v2 = vmul.f32 %v1237_v52, %v800_v15  ;;  %v805_v45 = vmul.f32 %v1269_v11, %v799_v21  ;;  %v872_v39 = vsel %vm496_vm1, %v863_v31, 0 }
 0x682   :  { %v866_v22 = vpack.c.bf16 %v806_v34, %v806_v34  ;;  %v864_v48 = vpack.c.bf16 %v804_v2, %v804_v2  ;;  %v865_v58 = vpack.c.bf16 %v805_v45, %v805_v45  ;;  %v754_v23 = vpop.permute.xlu1 %753  ;;  %v752_v6 = vpop.permute.xlu0 %751 }
 0x683   :  { %v761_v62 = vsel %vm332_vm2, %v752_v6, %v754_v23 }
 0x684   :  { %993 = vmatprep.subr.msk.bf16.mxu0 %vm496_vm1, %v864_v48  ;;  %995 = vmatprep.subr.msk.bf16.mxu1 %vm496_vm1, %v866_v22  ;;  %v878_v20 = vsel %vm496_vm1, %v865_v58, 0  ;;  %v763_v45 = vmul.f32 %v761_v62, %v1287_v28  ;;  %v724_v28 = vmul.f32 %v1505_v37, %v1300_v35  ;;  %v726_v35 = vmul.f32 %v1513_v40, %v1344_v63 }
 0x685   :  { %890 = vmatpush1.bf16.msra.mxu0 %v872_v39  ;;  %931 = vmatpush1.bf16.msra.mxu1 %v878_v20 }
 0x686   :  { %v758_v12 = vpop.permute.xlu1 %757  ;;  %v756_v50 = vpop.permute.xlu0 %755 }
 0x687   :  { %v762_v11 = vsel %vm332_vm2, %v758_v12, %v752_v6  ;;  %v760_v36 = vsel %vm332_vm2, %v754_v23, %v756_v50  ;;  %v759_v14 = vsel %vm332_vm2, %v756_v50, %v758_v12 }
 0x688   :  { %v766_v27 = vmul.f32 %v762_v11, %v1328_v57  ;;  %v764_v16 = vmul.f32 %v760_v36, %v1256_v4  ;;  %v765_v34 = vmul.f32 %v759_v14, %v1325_v56 }
 0x68a   :  { %v774_v52 = vpop.permute.xlu1 %773  ;;  %v772_v19 = vpop.permute.xlu0 %771 }
 0x68b   :  { %v781_v9 = vsel %vm369_vm3, %v772_v19, %v774_v52 }
 0x68c   :  { %v783_v60 = vmul.f32 %v781_v9, %v1292_v30 }
 0x68e   :  { %v778_v17 = vpop.permute.xlu1 %777  ;;  %v776_v55 = vpop.permute.xlu0 %775  ;;  %v859_v6 = vpack.c.bf16 %v783_v60, %v763_v45 }
 0x68f   :  { %v782_v21 = vsel %vm369_vm3, %v778_v17, %v772_v19  ;;  %v779_v15 = vsel %vm369_vm3, %v776_v55, %v778_v17  ;;  %v780_v31 = vsel %vm369_vm3, %v774_v52, %v776_v55 }
 0x690   :  { %v786_v2 = vmul.f32 %v782_v21, %v1321_v54  ;;  %v784_v57 = vmul.f32 %v780_v31, %v1260_v5  ;;  %v785_v4 = vmul.f32 %v779_v15, %v1311_v49  ;;  %v725_v5 = vmul.f32 %v1511_v25, %v1364_v18 }
 0x692   :  { %v861_v30 = vpack.c.bf16 %v785_v4, %v765_v34  ;;  %v734_v22 = vpop.permute.xlu1 %733  ;;  %v732_v48 = vpop.permute.xlu0 %731  ;;  %v860_v58 = vpack.c.bf16 %v784_v57, %v764_v16  ;;  %v862_v23 = vpack.c.bf16 %v786_v2, %v766_v27 }
 0x693   :  { %v741_v39 = vsel %vm295_vm4, %v732_v48, %v734_v22 }
 0x694   :  { %891 = vmatprep.subr.bf16.mxu0 %v860_v58  ;;  %932 = vmatprep.subr.bf16.mxu1 %v862_v23  ;;  %v743_v56 = vmul.f32 %v741_v39, %v1341_v8  ;;  %v723_v8 = vmul.f32 %v1503_v1, %v1335_v43 }
 0x695   :  { %892 = vmatpush1.bf16.msra.mxu0 %v859_v6  ;;  %933 = vmatpush1.bf16.msra.mxu1 %v861_v30 }
 0x696   :  { %v738_v54 = vpop.permute.xlu1 %737  ;;  %v736_v49 = vpop.permute.xlu0 %735  ;;  %v855_v14 = vpack.c.bf16 %v743_v56, %v723_v8 }
 0x697   :  { %v742_v20 = vsel %vm295_vm4, %v738_v54, %v732_v48  ;;  %v739_v12 = vsel %vm295_vm4, %v736_v49, %v738_v54  ;;  %v740_v50 = vsel %vm295_vm4, %v734_v22, %v736_v49 }
 0x698   :  { %v746_v52 = vmul.f32 %v742_v20, %v1355_v10  ;;  %v744_v19 = vmul.f32 %v740_v50, %v1305_v38  ;;  %v745_v18 = vmul.f32 %v739_v12, %v1338_v0 }
 0x69a   :  { %v857_v37 = vpack.c.bf16 %v745_v18, %v725_v5  ;;  %v686_v25 = vpop.permute.xlu1 %685  ;;  %v684_v11 = vpop.permute.xlu0 %683  ;;  %v856_v36 = vpack.c.bf16 %v744_v19, %v724_v28  ;;  %v858_v9 = vpack.c.bf16 %v746_v52, %v726_v35 }
 0x69b   :  { %v693_v0 = vsel %vm197_vm5, %v684_v11, %v686_v25 }
 0x69c   :  { %893 = vmatprep.subr.bf16.mxu0 %v856_v36  ;;  %934 = vmatprep.subr.bf16.mxu1 %v858_v9  ;;  %v696_v40 = vmul.f32 %v693_v0, %v1385_v53  ;;  %v1025_v9 = vld [vmem:[#allocation3 + $0x8] sm:$0xff] }
 0x69d   :  { %894 = vmatpush1.bf16.msra.mxu0 %v855_v14  ;;  %935 = vmatpush1.bf16.msra.mxu1 %v857_v37 }
 0x69e   :  { %v690_v10 = vpop.permute.xlu1 %689  ;;  %v688_v38 = vpop.permute.xlu0 %687 }
 0x69f   :  { %v694_v43 = vsel %vm197_vm5, %v690_v10, %v684_v11  ;;  %v692_v27 = vsel %vm197_vm5, %v686_v25, %v688_v38  ;;  %v691_v17 = vsel %vm197_vm5, %v688_v38, %v690_v10  ;;  %v867_v25 = vld [vmem:[%s1695_s4] sm:$0xf]  ;;  %v1026_v38 = vld [vmem:[#allocation3 + $0x18] sm:$0xff]  ;;  %s1067_s4 = scalar_lea.vmem %s976_s16, 512 }
 0x6a0   :  { %v695_v55 = vmul.f32 %v694_v43, %v1403_v3  ;;  %v697_v31 = vmul.f32 %v692_v27, %v1438_v47  ;;  %p1068_p10 = scmp.ne.s32.totalorder %s976_s16, %s1067_s4  ;;  %p1073_p12 = scmp.lt.s32.totalorder %s1067_s4, %s1067_s4 }
 0x6a2   :  { %v706_v62 = vpop.permute.xlu1 %705  ;;  %v704_v63 = vpop.permute.xlu0 %703  ;;  %p1074_p13 = por %p1073_p12, %p1072_p11 }
 0x6a3   :  { %v713_v1 = vsel %vm234_vm6, %v704_v63, %v706_v62 }
 0x6a4   :  { %v716_v16 = vmul.f32 %v713_v1, %v1388_v44  ;;  %v698_v44 = vmul.f32 %v691_v17, %v1441_v51  ;;  %p1075_p0 = pnand %p1074_p13, %p1068_p10 }
 0x6a6   :  { %v710_v60 = vpop.permute.xlu1 %709  ;;  %v708_v21 = vpop.permute.xlu0 %707  ;;  %v852_v15 = vpack.c.bf16 %v716_v16, %v696_v40 }
 0x6a7   :  { %v714_v34 = vsel %vm234_vm6, %v710_v60, %v704_v63  ;;  %v711_v53 = vsel %vm234_vm6, %v708_v21, %v710_v60  ;;  %v712_v2 = vsel %vm234_vm6, %v706_v62, %v708_v21 }
 0x6a8   :  { %v715_v57 = vmul.f32 %v714_v34, %v1398_v59  ;;  %v717_v3 = vmul.f32 %v712_v2, %v1431_v33  ;;  %v718_v4 = vmul.f32 %v711_v53, %v1428_v61  ;;  %895 = vmatprep.subr.bf16.mxu0 %v852_v15 }
 0x6aa   :  { %v851_v45 = vpack.c.bf16 %v715_v57, %v695_v55  ;;  %v853_v47 = vpack.c.bf16 %v717_v3, %v697_v31  ;;  %v646_v30 = vpop.permute.xlu1 %645  ;;  %v644_v22 = vpop.permute.xlu0 %643  ;;  %v854_v48 = vpack.c.bf16 %v718_v4, %v698_v44 }
 0x6ab   :  { %v653_v51 = vsel %vm123_vm7, %v644_v22, %v646_v30 }
 0x6ac   :  { %896 = vmatpush1.bf16.msra.mxu0 %v851_v45  ;;  %936 = vmatprep.subr.bf16.mxu1 %v854_v48  ;;  %v656_v39 = vmul.f32 %v653_v51, %v1418_v29 }
 0x6ad   :  { %937 = vmatpush1.bf16.msra.mxu1 %v853_v47 }
 0x6ae   :  { %v650_v58 = vpop.permute.xlu1 %649  ;;  %v648_v23 = vpop.permute.xlu0 %647 }
 0x6af   :  { %v654_v33 = vsel %vm123_vm7, %v650_v58, %v644_v22  ;;  %v652_v54 = vsel %vm123_vm7, %v646_v30, %v648_v23  ;;  %v651_v49 = vsel %vm123_vm7, %v648_v23, %v650_v58 }
 0x6b0   :  { %v655_v28 = vmul.f32 %v654_v33, %v1456_v26  ;;  %v657_v50 = vmul.f32 %v652_v54, %v1475_v32 }
 0x6b2   :  { %v666_v6 = vpop.permute.xlu1 %665  ;;  %v664_v59 = vpop.permute.xlu0 %663 }
 0x6b3   :  { %v673_v61 = vsel %vm160_vm8, %v664_v59, %v666_v6 }
 0x6b4   :  { %v676_v5 = vmul.f32 %v673_v61, %v1421_v13  ;;  %v658_v13 = vmul.f32 %v651_v49, %v1478_v42 }
 0x6b6   :  { %v670_v56 = vpop.permute.xlu1 %669  ;;  %v668_v20 = vpop.permute.xlu0 %667  ;;  %v848_v12 = vpack.c.bf16 %v676_v5, %v656_v39 }
 0x6b7   :  { %v674_v52 = vsel %vm160_vm8, %v670_v56, %v664_v59  ;;  %v671_v29 = vsel %vm160_vm8, %v668_v20, %v670_v56  ;;  %v672_v19 = vsel %vm160_vm8, %v666_v6, %v668_v20 }
 0x6b8   :  { %v675_v18 = vmul.f32 %v674_v52, %v1449_v7  ;;  %v677_v26 = vmul.f32 %v672_v19, %v1465_v41  ;;  %v678_v35 = vmul.f32 %v671_v29, %v1468_v24  ;;  %897 = vmatprep.subr.bf16.mxu0 %v848_v12  ;;  %v1023_v7 = vld [vmem:[#allocation3] sm:$0xff]  ;;  %v1024_v24 = vld [vmem:[#allocation3 + $0x10] sm:$0xff] }
 0x6ba   :  { %v847_v8 = vpack.c.bf16 %v675_v18, %v655_v28  ;;  %v849_v32 = vpack.c.bf16 %v677_v26, %v657_v50  ;;  %v850_v37 = vpack.c.bf16 %v678_v35, %v658_v13 }
 0x6bc   :  { %898 = vmatpush1.bf16.msra.mxu0 %v847_v8  ;;  %938 = vmatprep.subr.bf16.mxu1 %v850_v37 }
 0x6bd   :  { %939 = vmatpush1.bf16.msra.mxu1 %v849_v32 }
 0x6bf   :  { %994 = vmatmul.mubr.msk.bf16.vlgmr.msra.gmra.mxu0 %vm492_vm9, %v867_v25 }
 0x6c0   :  { %996 = vmatmul.mubr.msk.bf16.vlgmr.msra.gmra.mxu1 %vm492_vm9, %v867_v25 }
 0x77f   :  { %v917_v46 = vpop.f32.mrf.mxu0 }
 0x780   :  { %v918_v41 = vadd.f32 %v1023_v7, %v917_v46  ;;  %v958_v42 = vpop.f32.mrf.mxu1 }
 0x781   :  { %v959_v11 = vadd.f32 %v1024_v24, %v958_v42  ;;  %v919_v36 = vpop.f32.mrf.mxu0 }
 0x782   :  { %965 = vst [vmem:[#allocation8] sm:$0xff] %v918_v41  ;;  %v920_v14 = vadd.f32 %v1025_v9, %v919_v36  ;;  %v960_v10 = vpop.f32.mrf.mxu1 }
 0x783   :  { %967 = vst [vmem:[#allocation8 + $0x10] sm:$0xff] %v959_v11  ;;  %v961_v0 = vadd.f32 %v1026_v38, %v960_v10  ;;  %v921_v62 = vpop.f32.mrf.mxu0 }
 0x784   :  { %966 = vst [vmem:[#allocation8 + $0x8] sm:$0xff] %v920_v14  ;;  %v962_v63 = vpop.f32.mrf.mxu1 }
 0x785   :  { %968 = vst [vmem:[#allocation8 + $0x18] sm:$0xff] %v961_v0  ;;  %v922_v43 = vpop.f32.mrf.mxu0 }
 0x786   :  { %v963_v1 = vpop.f32.mrf.mxu1 }
 0x787   :  { %1078 = shalt.err (!%p1075_p0)
}
 0x788   :  { %978 = dma.vmem_to_hbm [thread:$0]  %s976_s16, 512, %s1696_s5, [#allocation5]  }
 0x789   :  { %1091 = dma.done.wait [#allocation5], 512  }
 0x78a   :  { %1092 = vsyncadd [#allocation5], 4294966784 }
 0x78b   :  { %982 = vsyncpa [#allocation4], 1 }
 0x78c   :  { %983 = vsyncpa [#allocation7], 1 }
 0x78d   :  { %984 = vsyncpa [#allocation5], 1 }

</bundles_post_ra>
